<compile_context>
chip_gen: v5e
topology: v5e:2x2
jax: 0.10.0
libtpu: 0.0.40
codegen_flags: <defaults>
</compile_context>

<pallas_src>
from functools import partial

import jax
import jax.numpy as jnp
from jax.experimental import pallas as pl
from jax.experimental.pallas import tpu as pltpu


def _clip_boxes_kernel(boxes_ref, out_ref, *, w_max, h_max):
    # boxes_ref block: (TR, L) with L % 4 == 0, so the box-coordinate index of
    # every element is simply (lane index) % 4.
    b = boxes_ref[...]
    coord = jax.lax.broadcasted_iota(jnp.int32, b.shape, dimension=1) % 4
    # coord 0 (x1) / 1 (y1): clamp at min=0
    # coord 2 (x2): clamp at max=W-1 ; coord 3 (y2): clamp at max=H-1
    upper = jnp.where(coord == 2, w_max, h_max).astype(b.dtype)
    out_ref[...] = jnp.where(coord < 2, jnp.maximum(b, 0), jnp.minimum(b, upper))


def clip_boxes(boxes, img):
    """boxes: (B, N, 4) float; img: (B, C, H, W) — only the static H, W are used."""
    B, _, H, W = img.shape
    Bb, N, four = boxes.shape
    assert four == 4 and Bb == B
    total = B * N * 4

    # Lane-dense 2-D view (R, L): pick the widest L (multiple of 128) dividing
    # the flattened size; otherwise one full-array (B, N*4) block.
    L = next((c for c in (2048, 1024, 512, 256, 128) if total % c == 0), None)
    if L is None:
        view = (B, N * 4)
        R, L = view
        TR = R  # single full-array block
    else:
        R = total // L
        view = (R, L)
        # ~2 MiB tiles; target_rows is always a multiple of 8 for L >= 128.
        target_rows = max(8, (2 * 1024 * 1024) // (L * boxes.dtype.itemsize))
        TR = R if R <= target_rows else target_rows

    grid = (pl.cdiv(R, TR),)
    kernel = partial(_clip_boxes_kernel, w_max=float(W - 1), h_max=float(H - 1))

    boxes2d = boxes.reshape(view)
    out2d = pl.pallas_call(
        kernel,
        out_shape=jax.ShapeDtypeStruct(view, boxes.dtype),
        grid=grid,
        in_specs=[pl.BlockSpec((TR, L), lambda i: (i, 0))],
        out_specs=pl.BlockSpec((TR, L), lambda i: (i, 0)),
        compiler_params=pltpu.CompilerParams(dimension_semantics=("parallel",)),
    )(boxes2d)
    return out2d.reshape(B, N, 4)


def _clip_boxes_ref(boxes, img):
    _, _, H, W = img.shape
    x1 = jnp.maximum(boxes[:, :, 0], 0.0)
    y1 = jnp.maximum(boxes[:, :, 1], 0.0)
    x2 = jnp.minimum(boxes[:, :, 2], float(W - 1))
    y2 = jnp.minimum(boxes[:, :, 3], float(H - 1))
    return jnp.stack([x1, y1, x2, y2], axis=-1)


if __name__ == "__main__":
    key = jax.random.PRNGKey(0)
    k1, k2, k3, k4 = jax.random.split(key, 4)

    # Case 1: small shape consistent with the module (hits the full-array
    # fallback path): B=2, C=4, H=W=16, N=8 boxes.
    B, C, H, W = 2, 4, 16, 16
    N = 8
    boxes = jax.random.uniform(k1, (B, N, 4), jnp.float32, minval=-8.0, maxval=24.0)
    img = jax.random.normal(k2, (B, C, H, W), dtype=jnp.float32)
    out = jax.block_until_ready(clip_boxes(boxes, img))
    ref = _clip_boxes_ref(boxes, img)
    assert out.shape == boxes.shape and out.dtype == boxes.dtype
    assert jnp.allclose(out, ref), "mismatch vs reference (small case)"

    # Case 2: size divisible by 128 — exercises the lane-dense (R, L) path
    # with asymmetric H/W so the x2 / y2 clamps are distinguished.
    B2, C2, H2, W2 = 8, 3, 24, 32
    N2 = 256  # 8*256*4 = 8192 elements -> L=2048, R=4
    boxes2 = jax.random.uniform(k3, (B2, N2, 4), jnp.float32, minval=-10.0, maxval=40.0)
    img2 = jax.random.normal(k4, (B2, C2, H2, W2), dtype=jnp.float32)
    out2 = jax.block_until_ready(clip_boxes(boxes2, img2))
    ref2 = _clip_boxes_ref(boxes2, img2)
    assert out2.shape == boxes2.shape and out2.dtype == boxes2.dtype
    assert jnp.allclose(out2, ref2), "mismatch vs reference (lane-dense case)"

    print("KERNEL_OK")
</pallas_src>

<mosaic_0001>
module attributes {stable_mosaic.version = 11 : i64} {
  func.func @_clip_boxes_kernel(%arg0: i32, %arg1: memref<2x32xf32, #tpu.memory_space<vmem>>, %arg2: memref<2x32xf32, #tpu.memory_space<vmem>>) attributes {dimension_semantics = [#tpu.dimension_semantics<parallel>], iteration_bounds = array<i64: 1>, scalar_prefetch = 0 : i64, scratch_operands = 0 : i64, tpu.core_type = #tpu.core_type<tc>, window_params = [{transform_indices = @transform_0, window_bounds = array<i64: 2, 32>}, {transform_indices = @transform_1, window_bounds = array<i64: 2, 32>}]} {
    %c0 = arith.constant 0 : index
    %c0_0 = arith.constant 0 : index
    %0 = vector.load %arg1[%c0, %c0_0] : memref<2x32xf32, #tpu.memory_space<vmem>>, vector<2x32xf32>
    %1 = tpu.iota {dimensions = array<i32: 1>} : vector<2x32xi32>
    %c4_i32 = arith.constant 4 : i32
    %c0_i32 = arith.constant 0 : i32
    %2 = arith.cmpi eq, %c4_i32, %c0_i32 : i32
    %c1_i32 = arith.constant 1 : i32
    %3 = arith.select %2, %c1_i32, %c4_i32 : i32
    %4 = vector.broadcast %3 : i32 to vector<2x32xi32>
    %5 = arith.remsi %1, %4 : vector<2x32xi32>
    %c0_i32_1 = arith.constant 0 : i32
    %6 = vector.broadcast %c0_i32_1 : i32 to vector<2x32xi32>
    %7 = arith.cmpi ne, %5, %6 : vector<2x32xi32>
    %c0_i32_2 = arith.constant 0 : i32
    %8 = vector.broadcast %c0_i32_2 : i32 to vector<2x32xi32>
    %9 = arith.cmpi slt, %5, %8 : vector<2x32xi32>
    %c0_i32_3 = arith.constant 0 : i32
    %10 = arith.cmpi slt, %3, %c0_i32_3 : i32
    %11 = vector.broadcast %10 : i1 to vector<2x32xi1>
    %12 = vector.broadcast %11 : vector<2x32xi1> to vector<2x32xi1>
    %13 = arith.xori %9, %12 : vector<2x32xi1>
    %14 = arith.andi %13, %7 : vector<2x32xi1>
    %15 = vector.broadcast %3 : i32 to vector<2x32xi32>
    %16 = arith.addi %5, %15 : vector<2x32xi32>
    %17 = arith.select %14, %16, %5 : vector<2x32xi1>, vector<2x32xi32>
    %c2_i32 = arith.constant 2 : i32
    %18 = vector.broadcast %c2_i32 : i32 to vector<2x32xi32>
    %19 = arith.cmpi eq, %17, %18 : vector<2x32xi32>
    %cst = arith.constant 1.500000e+01 : f32
    %cst_4 = arith.constant 1.500000e+01 : f32
    %20 = vector.broadcast %cst : f32 to vector<2x32xf32>
    %21 = vector.broadcast %cst_4 : f32 to vector<2x32xf32>
    %22 = arith.select %19, %20, %21 : vector<2x32xi1>, vector<2x32xf32>
    %c2_i32_5 = arith.constant 2 : i32
    %23 = vector.broadcast %c2_i32_5 : i32 to vector<2x32xi32>
    %24 = arith.cmpi slt, %17, %23 : vector<2x32xi32>
    %cst_6 = arith.constant 0.000000e+00 : f32
    %25 = vector.broadcast %cst_6 : f32 to vector<2x32xf32>
    %26 = arith.maximumf %0, %25 : vector<2x32xf32>
    %27 = arith.minimumf %0, %22 : vector<2x32xf32>
    %28 = arith.select %24, %26, %27 : vector<2x32xi1>, vector<2x32xf32>
    %c0_7 = arith.constant 0 : index
    %c0_8 = arith.constant 0 : index
    %29 = vector.load %arg2[%c0_7, %c0_8] : memref<2x32xf32, #tpu.memory_space<vmem>>, vector<2x32xf32>
    tpu.vector_store %arg2[%c0_7, %c0_8], %28 {strides = array<i32>} : memref<2x32xf32, #tpu.memory_space<vmem>>, vector<2x32xf32>,
    return
  }
  func.func @transform_0(%arg0: i32) -> (i32, i32) {
    %c0_i32 = arith.constant 0 : i32
    %c0_i32_0 = arith.constant 0 : i32
    return %arg0, %c0_i32 : i32, i32
  }
  func.func @transform_1(%arg0: i32) -> (i32, i32) {
    %c0_i32 = arith.constant 0 : i32
    %c0_i32_0 = arith.constant 0 : i32
    return %arg0, %c0_i32 : i32, i32
  }
}

</mosaic_0001>

<bundles_post_ra>
// kernel: tpu_custom_call.1
= control target key start
LH: loop header
LB: loop body
LE: loop exit
PB: predicated region body
PF: predicated region fallthrough
CT: control target
= control target key end

     0   :  { %6 = vsyncpa [#allocation3], 0  ;;  %s133_s0 = inlined_call_operand.hbm [shape: f32[2,32], index: 0, kind: input, shape index: {}]   ;;  %s134_s1 = inlined_call_operand.hbm [shape: f32[2,32], index: 1, kind: output, shape index: {}]  }
   0x1   :  { %7 = vsyncpa [#allocation4], 0  ;;  %s13_s8 = sshll.u32 %s133_s0, 4  ;;  %s115_s9 = smov [#allocation2]   ;;  %s14_s8 = int_to_ptr.hbm [resolvable:$true] %s13_s8 }
   0x2   :  { %s15_s10 = sshll.u32 %s115_s9, 4  ;;  %s16_s10 = int_to_ptr.vmem [resolvable:$true] %s15_s10 }
   0x3   :  { %18 = dma.hbm_to_vmem [thread:$0]  %s14_s8, 32, %s16_s10, [#allocation3]  }
   0x4   :  { %111 = dma.done.wait [#allocation3], 32  }
   0x5   :  { %112 = vsyncadd [#allocation3], 4294967264  ;;  %v24_v0 = vlaneseq  ;;  %s116_s11 = smov [#allocation5]   ;;  %s51_s15 = sshll.u32 %s134_s1, 4  ;;  %v23_v3 = vld [vmem:[#allocation2] sm:$0x3]  ;;  %s52_s15 = int_to_ptr.hbm [resolvable:$true] %s51_s15 }
   0x6   :  { %s49_s12 = sshll.u32 %s116_s11, 4  ;;  %v39_v4 = vmax.f32 %v23_v3, 0.0  ;;  %v40_v5 = vmin.f32 %v23_v3, 15.0  ;;  %vm42_vm1 = vcmask 254976   ;;  %s50_s12 = int_to_ptr.vmem [resolvable:$true] %s49_s12 }
   0x7   :  { %v25_v1 = vand.u32 127, %v24_v0 }
   0x9   :  { %v30_v2 = vand.u32 3, %v25_v1 }
   0xb   :  { %vm38_vm0 = vcmp.lt.s32.totalorder %v30_v2, 2 }
   0xc   :  { %v41_v6 = vsel %vm38_vm0, %v39_v4, %v40_v5 }
   0xd   :  { %43 = vst.msk [vmem:[#allocation5] sm:$0x3] %vm42_vm1, %v41_v6 }
   0xe   :  { %54 = dma.vmem_to_hbm [thread:$0]  %s50_s12, 32, %s52_s15, [#allocation4]  }
   0xf   :  { %113 = dma.done.wait [#allocation4], 32  }
  0x10   :  { %114 = vsyncadd [#allocation4], 4294967264 }
  0x11   :  { %59 = vsyncpa [#allocation3], 1 }
  0x12   :  { %60 = vsyncpa [#allocation4], 1 }

</bundles_post_ra>
